<compile_context>
chip_gen: v7x
topology: tpu7x:2x2x1
jax: 0.10.0
libtpu: 0.0.40
codegen_flags: <defaults>
</compile_context>

<pallas_src>
import math
import functools

import jax
import jax.numpy as jnp
from jax import lax
from jax.experimental import pallas as pl
from jax.experimental.pallas import tpu as pltpu

_SQRT2 = math.sqrt(2.0)
_LRELU_SLOPE = 0.2
# (m, k) x (n, k) -> (m, n): transposed-RHS contraction, lowered onto the MXU without an
# in-kernel transpose and without materializing weight.T in the wrapper.
_TRANS_B_DIMS = (((1,), (1,)), ((), ()))


def _cdiv(a, b):
    return (a + b - 1) // b


def _round_up(x, m):
    return _cdiv(x, m) * m


def _physical_vmem_bytes():
    """Per-core VMEM capacity (v5e/v6e 128 MiB, v7x 64 MiB); conservative fallback."""
    try:
        v = int(pltpu.get_tpu_info().vmem_capacity_bytes)
        if v >= 16 * 1024 * 1024:
            return v
    except Exception:
        pass
    return 64 * 1024 * 1024


def _finalize(acc, b_ref, scale, fused_lrelu):
    # `scale` already folds lr_mul/sqrt(in_dim) (and sqrt(2) when activated); the bias row
    # already folds bias*lr_mul (and sqrt(2) when activated): one FMA (+ one vmax).
    out = acc * scale
    if b_ref is not None:
        out = out + b_ref[...].astype(jnp.float32)     # (1, tn) broadcasts over (tm, tn)
    if fused_lrelu:
        out = jnp.maximum(out, _LRELU_SLOPE * out)     # leaky_relu(x, 0.2)
    return out


def _equal_linear_kernel(*refs, scale, fused_lrelu, has_bias, single_k):
    if has_bias:
        x_ref, w_ref, b_ref = refs[:3]
        rest = refs[3:]
    else:
        (x_ref, w_ref), b_ref = refs[:2], None
        rest = refs[2:]

    # (tm, tk) @ (tn, tk)^T on the MXU; operands in native dtype, f32 accumulation.
    part = lax.dot_general(x_ref[...], w_ref[...], _TRANS_B_DIMS,
                           preferred_element_type=jnp.float32)

    if single_k:
        # Whole reduction in one block: no accumulator scratch, no init/finalize phases.
        (o_ref,) = rest
        o_ref[...] = _finalize(part, b_ref, scale, fused_lrelu).astype(o_ref.dtype)
        return

    o_ref, acc_ref = rest
    k = pl.program_id(2)

    @pl.when(k == 0)
    def _():
        acc_ref[...] = part            # overwrite on the first K step (no zero-init + add)

    @pl.when(k > 0)
    def _():
        acc_ref[...] += part

    @pl.when(k == pl.num_programs(2) - 1)
    def _():
        o_ref[...] = _finalize(acc_ref[...], b_ref, scale, fused_lrelu).astype(o_ref.dtype)


def equal_linear(x, weight, bias=None, *, lr_mul=1.0, activation=None,
                 operand_dtype=None, tm=None, tn=None, tk=None):
    """EqualLinear forward.

    x:      (..., in_dim)
    weight: (out_dim, in_dim)   -- used as-is (no transpose / pad materialization)
    bias:   (out_dim,) or None
    operand_dtype: optional MXU operand dtype (e.g. jnp.bfloat16); accumulation stays f32.
    """
    orig_shape = x.shape
    in_dim = orig_shape[-1]
    out_dim, w_in = weight.shape
    if w_in != in_dim:
        raise ValueError(f"weight.shape[1]={w_in} != in_dim={in_dim}")

    x2 = x.reshape(-1, in_dim)
    B, K, N = x2.shape[0], in_dim, out_dim

    fused_lrelu = activation is not None
    gain = _SQRT2 if fused_lrelu else 1.0                 # fused_leaky_relu output gain
    scale = (1.0 / math.sqrt(in_dim)) * lr_mul * gain     # sqrt(2) folded into the scale

    out_dtype = x.dtype
    if operand_dtype is None:
        operand_dtype = jnp.promote_types(x.dtype, weight.dtype)
    operand_dtype = jnp.dtype(operand_dtype)
    op_b = operand_dtype.itemsize
    out_b = jnp.dtype(out_dtype).itemsize

    x2 = x2.astype(operand_dtype)        # no-ops when dtypes already match
    w = weight.astype(operand_dtype)

    # ---- tile selection, sized against this generation's VMEM --------------------------
    phys_vmem = _physical_vmem_bytes()
    budget = min(phys_vmem * 6 // 10, 48 * 1024 * 1024)

    if tm is None:
        # Multiple of 8, or exactly the full M extent (both satisfy the (8,128) rule).
        tm = B if B <= 512 else 512
    if tn is None:
        if N % 128 == 0:
            tn = min(1024, N)
            # Keep both v7x TensorCores busy: ensure a "parallel" grid axis has >= 2 blocks.
            if _cdiv(B, tm) == 1 and tn == N and N > 128:
                tn = _round_up(_cdiv(N, 2), 128)
        else:
            tn = N          # full-dim block: no N padding; lane dim == full array dim is legal

    def _ws_bytes(tk_, multi_k):
        ws = 2 * op_b * tk_ * (tm + tn) + 2 * out_b * tm * tn   # double-buffered tiles
        if bias is not None:
            ws += 2 * 4 * tn
        if multi_k:
            ws += 4 * tm * tn                                   # f32 accumulator scratch
        return ws

    pad_k = False
    if tk is None:
        if _ws_bytes(K, multi_k=False) <= budget:
            tk = K                                              # single-K fast path
        elif K % 128 == 0:
            tk = (min(1024, K) // 128) * 128
            while tk > 128 and (K % tk != 0 or _ws_bytes(tk, True) > budget):
                tk -= 128                                       # largest lane-aligned divisor
        else:
            tk = 512                                            # rare: zero-pad K (never M/N)
            while tk > 128 and _ws_bytes(tk, True) > budget:
                tk -= 128
            pad_k = True
    else:
        pad_k = (tk != K) and (K % tk != 0)

    single_k = (tk >= K) and not pad_k
    K_p = _round_up(K, tk) if pad_k else K
    if pad_k:
        # Zero-pad the contraction dim only (garbage K would corrupt valid outputs).
        x2 = jnp.pad(x2, ((0, 0), (0, K_p - K)))
        w = jnp.pad(w, ((0, 0), (0, K_p - K)))

    grid_m, grid_n = _cdiv(B, tm), _cdiv(N, tn)

    args = [x2, w]
    if single_k:
        grid = (grid_m, grid_n)
        in_specs = [pl.BlockSpec((tm, tk), lambda i, j: (i, 0)),
                    pl.BlockSpec((tn, tk), lambda i, j: (j, 0))]
        bias_spec = pl.BlockSpec((1, tn), lambda i, j: (0, j))
        out_spec = pl.BlockSpec((tm, tn), lambda i, j: (i, j))
        scratch = []
        sem = ("parallel", "parallel")
    else:
        grid = (grid_m, grid_n, K_p // tk)
        in_specs = [pl.BlockSpec((tm, tk), lambda i, j, k: (i, k)),
                    pl.BlockSpec((tn, tk), lambda i, j, k: (j, k))]
        bias_spec = pl.BlockSpec((1, tn), lambda i, j, k: (0, j))
        out_spec = pl.BlockSpec((tm, tn), lambda i, j, k: (i, j))
        scratch = [pltpu.VMEM((tm, tn), jnp.float32)]
        sem = ("parallel", "parallel", "arbitrary")

    if bias is not None:
        # Fold lr_mul (and the fused_leaky_relu sqrt(2) gain) into the bias once.
        args.append((bias.astype(jnp.float32) * (lr_mul * gain)).reshape(1, N))
        in_specs.append(bias_spec)

    kernel = functools.partial(
        _equal_linear_kernel, scale=scale, fused_lrelu=fused_lrelu,
        has_bias=bias is not None, single_k=single_k)

    vmem_limit = int(min(phys_vmem,
                         max(32 * 1024 * 1024,
                             _ws_bytes(tk, not single_k) + 16 * 1024 * 1024)))

    out = pl.pallas_call(
        kernel,
        out_shape=jax.ShapeDtypeStruct((B, N), out_dtype),   # exact shape: no M/N pad/slice
        grid=grid,
        in_specs=in_specs,
        out_specs=out_spec,
        scratch_shapes=scratch,
        compiler_params=pltpu.CompilerParams(
            dimension_semantics=sem,
            vmem_limit_bytes=vmem_limit),
    )(*args)

    return out.reshape(orig_shape[:-1] + (N,))


def _reference(x, weight, bias, *, lr_mul=1.0, activation=None):
    in_dim = x.shape[-1]
    scale = 1.0 / math.sqrt(in_dim) * lr_mul
    out = jnp.matmul(x, (weight * scale).T)
    if bias is not None:
        out = out + bias * lr_mul
    if activation is not None:
        out = jnp.where(out >= 0, out, _LRELU_SLOPE * out) * _SQRT2
    return out


if __name__ == "__main__":
    key = jax.random.PRNGKey(0)
    k1, k2, k3, k4, k5, k6 = jax.random.split(key, 6)

    # 1) Small module shapes: EqualLinear(32, 32, bias_init=0.1, lr_mul=0.5).
    B1, K1, N1 = 8, 32, 32
    lr_mul = 0.5
    x1 = jax.random.normal(k1, (B1, K1), dtype=jnp.float32)
    w1 = jax.random.normal(k2, (N1, K1), dtype=jnp.float32) / lr_mul
    b1 = jnp.full((N1,), 0.1, dtype=jnp.float32)
    for act in (None, "fused_lrelu"):
        out = equal_linear(x1, w1, b1, lr_mul=lr_mul, activation=act)
        jax.block_until_ready(out)
        ref = _reference(x1, w1, b1, lr_mul=lr_mul, activation=act)
        assert out.shape == ref.shape
        assert jnp.allclose(out, ref, atol=1e-3, rtol=1e-3), f"case1 act={act}"

    # 2) Leading batch dims (e.g. style vectors shaped (batch, seq, dim)).
    x1b = jax.random.normal(k3, (2, 4, K1), dtype=jnp.float32)
    out = equal_linear(x1b, w1, b1, lr_mul=lr_mul, activation="fused_lrelu")
    jax.block_until_ready(out)
    ref = _reference(x1b, w1, b1, lr_mul=lr_mul, activation="fused_lrelu")
    assert jnp.allclose(out, ref, atol=1e-3, rtol=1e-3), "case2"

    # 3) Multi-step K reduction (accumulator path) with >=2 N blocks (megacore split).
    B3, K3, N3 = 16, 512, 256
    x3 = jax.random.normal(k4, (B3, K3), dtype=jnp.float32)
    w3 = jax.random.normal(k5, (N3, K3), dtype=jnp.float32)
    b3 = jnp.linspace(-1.0, 1.0, N3, dtype=jnp.float32)
    out = equal_linear(x3, w3, b3, activation="fused_lrelu", tk=128)
    jax.block_until_ready(out)
    ref = _reference(x3, w3, b3, activation="fused_lrelu")
    assert jnp.allclose(out, ref, atol=2e-2, rtol=2e-2), "case3"

    # 4) No-bias variant, single-K fast path (no accumulator scratch).
    out = equal_linear(x3, w3, None, activation=None)
    jax.block_until_ready(out)
    ref = _reference(x3, w3, None, activation=None)
    assert jnp.allclose(out, ref, atol=2e-2, rtol=2e-2), "case4"

    # 5) Non-aligned shapes: K zero-pad fallback + masked edge blocks (no M/N padding).
    B5, K5, N5 = 8, 200, 160
    x5 = jax.random.normal(k6, (B5, K5), dtype=jnp.float32)
    w5 = jax.random.normal(k2, (N5, K5), dtype=jnp.float32)
    b5 = jnp.linspace(-0.5, 0.5, N5, dtype=jnp.float32)
    out = equal_linear(x5, w5, b5, activation="fused_lrelu", tk=128)
    jax.block_until_ready(out)
    ref = _reference(x5, w5, b5, activation="fused_lrelu")
    assert jnp.allclose(out, ref, atol=2e-2, rtol=2e-2), "case5"

    # 6) Opt-in bf16 operand path (f32 accumulation, f32 output).
    out = equal_linear(x3, w3, b3, activation="fused_lrelu", operand_dtype=jnp.bfloat16)
    jax.block_until_ready(out)
    ref = _reference(x3, w3, b3, activation="fused_lrelu")
    assert jnp.allclose(out, ref, atol=6e-2, rtol=6e-2), "case6"

    print("KERNEL_OK")
</pallas_src>

<mosaic_0001>
module attributes {stable_mosaic.version = 11 : i64} {
  func.func @_equal_linear_kernel(%arg0: i32, %arg1: i32, %arg2: memref<8x32xf32, #tpu.memory_space<vmem>>, %arg3: memref<32x32xf32, #tpu.memory_space<vmem>>, %arg4: memref<1x32xf32, #tpu.memory_space<vmem>>, %arg5: memref<8x32xf32, #tpu.memory_space<vmem>>) attributes {dimension_semantics = [#tpu.dimension_semantics<parallel>, #tpu.dimension_semantics<parallel>], iteration_bounds = array<i64: 1, 1>, scalar_prefetch = 0 : i64, scratch_operands = 0 : i64, tpu.core_type = #tpu.core_type<tc>, window_params = [{transform_indices = @transform_0, window_bounds = array<i64: 8, 32>}, {transform_indices = @transform_1, window_bounds = array<i64: 32, 32>}, {transform_indices = @transform_2, window_bounds = array<i64: 1, 32>}, {transform_indices = @transform_3, window_bounds = array<i64: 8, 32>}]} {
    %c0 = arith.constant 0 : index
    %c0_0 = arith.constant 0 : index
    %0 = vector.load %arg2[%c0, %c0_0] : memref<8x32xf32, #tpu.memory_space<vmem>>, vector<8x32xf32>
    %c0_1 = arith.constant 0 : index
    %c0_2 = arith.constant 0 : index
    %1 = vector.load %arg3[%c0_1, %c0_2] : memref<32x32xf32, #tpu.memory_space<vmem>>, vector<32x32xf32>
    %cst = arith.constant dense<0.000000e+00> : vector<8x32xf32>
    %2 = tpu.matmul %0, %1, %cst {dimension_numbers = #tpu.dot_dimension_numbers<[1], [1], [0], [0], [0, 0, 1, 0], [], []>} : vector<8x32xf32>, vector<32x32xf32>, vector<8x32xf32> -> vector<8x32xf32>
    %cst_3 = arith.constant 0.0883883461 : f32
    %3 = vector.broadcast %cst_3 : f32 to vector<8x32xf32>
    %4 = arith.mulf %2, %3 : vector<8x32xf32>
    %c0_4 = arith.constant 0 : index
    %c0_5 = arith.constant 0 : index
    %5 = vector.load %arg4[%c0_4, %c0_5] : memref<1x32xf32, #tpu.memory_space<vmem>>, vector<1x32xf32>
    %6 = vector.broadcast %5 : vector<1x32xf32> to vector<8x32xf32>
    %7 = arith.addf %4, %6 : vector<8x32xf32>
    %c0_6 = arith.constant 0 : index
    %c0_7 = arith.constant 0 : index
    %8 = vector.load %arg5[%c0_6, %c0_7] : memref<8x32xf32, #tpu.memory_space<vmem>>, vector<8x32xf32>
    tpu.vector_store %arg5[%c0_6, %c0_7], %7 {strides = array<i32>} : memref<8x32xf32, #tpu.memory_space<vmem>>, vector<8x32xf32>,
    return
  }
  func.func @transform_0(%arg0: i32, %arg1: i32) -> (i32, i32) {
    %c0_i32 = arith.constant 0 : i32
    %c0_i32_0 = arith.constant 0 : i32
    return %arg0, %c0_i32 : i32, i32
  }
  func.func @transform_1(%arg0: i32, %arg1: i32) -> (i32, i32) {
    %c0_i32 = arith.constant 0 : i32
    %c0_i32_0 = arith.constant 0 : i32
    return %arg1, %c0_i32 : i32, i32
  }
  func.func @transform_2(%arg0: i32, %arg1: i32) -> (i32, i32) {
    %c0_i32 = arith.constant 0 : i32
    %c0_i32_0 = arith.constant 0 : i32
    return %c0_i32, %arg1 : i32, i32
  }
  func.func @transform_3(%arg0: i32, %arg1: i32) -> (i32, i32) {
    %c0_i32 = arith.constant 0 : i32
    return %arg0, %arg1 : i32, i32
  }
}

</mosaic_0001>

<bundles_post_ra>
// kernel: tpu_custom_call.1
= control target key start
LH: loop header
LB: loop body
LE: loop exit
PB: predicated region body
PF: predicated region fallthrough
CT: control target
= control target key end

     0   :  { %8 = vsyncpa [#allocation3], 0  ;;  %s346_s0 = inlined_call_operand.hbm [shape: f32[8,32], index: 0, kind: input, shape index: {}]   ;;  %s347_s1 = inlined_call_operand.hbm [shape: f32[32,32], index: 1, kind: input, shape index: {}]   ;;  %s348_s2 = inlined_call_operand.vmem [shape: f32[1,32], index: 2, kind: input, shape index: {}]   ;;  %s349_s3 = inlined_call_operand.hbm [shape: f32[8,32], index: 3, kind: output, shape index: {}]  }
   0x1   :  { %9 = vsyncpa [#allocation6], 0 }
   0x2   :  { %10 = vsyncpa [#allocation4], 0  ;;  %s268_s12 = smov [#allocation2]   ;;  %s269_s14 = smov [#allocation5]  }
   0x3   :  { %s17_s13 = sshll.u32 %s268_s12, 4  ;;  %s26_s15 = sshll.u32 %s269_s14, 4  ;;  %s18_s13 = int_to_ptr.vmem [resolvable:$true] %s17_s13  ;;  %s296_s15 = int_to_ptr.vmem [resolvable:$true] %s26_s15 }
   0x4   :  { %s196_s18 = scalar_lea.hbm %s346_s0, 128 }
   0x5   :  { %p197_p0 = scmp.ne.s32.totalorder %s346_s0, %s196_s18  ;;  %p200_p1 = scmp.lt.u32.totalorder %s196_s18, %s346_s0 }
   0x7   :  { %p202_p2 = pnand %p200_p1, %p197_p0 }
   0x9   :  { %205 = shalt.err (!%p202_p2)
}
   0xa   :  { %s206_s23 = scalar_lea.vmem %s18_s13, 128  ;;  %p211_p4 = scmp.lt.s32.totalorder %s18_s13, %s18_s13 }
   0xb   :  { %p207_p3 = scmp.ne.s32.totalorder %s18_s13, %s206_s23  ;;  %p212_p5 = scmp.lt.s32.totalorder %s206_s23, %s206_s23 }
   0xd   :  { %p213_p6 = por %p212_p5, %p211_p4 }
   0xf   :  { %p214_p7 = pnand %p213_p6, %p207_p3 }
  0x11   :  { %217 = shalt.err (!%p214_p7)
}
  0x12   :  { %20 = dma.hbm_to_vmem [thread:$0]  %s346_s0, 128, %s18_s13, [#allocation3]  }
  0x13   :  { %s218_s28 = scalar_lea.hbm %s347_s1, 512 }
  0x14   :  { %p219_p8 = scmp.ne.s32.totalorder %s347_s1, %s218_s28  ;;  %p222_p9 = scmp.lt.u32.totalorder %s218_s28, %s347_s1 }
  0x16   :  { %p224_p10 = pnand %p222_p9, %p219_p8 }
  0x18   :  { %227 = shalt.err (!%p224_p10)
}
  0x19   :  { %s228_s6 = scalar_lea.vmem %s296_s15, 512  ;;  %p233_p12 = scmp.lt.s32.totalorder %s296_s15, %s296_s15 }
  0x1a   :  { %p229_p11 = scmp.ne.s32.totalorder %s296_s15, %s228_s6  ;;  %p234_p13 = scmp.lt.s32.totalorder %s228_s6, %s228_s6 }
  0x1c   :  { %p235_p0 = por %p234_p13, %p233_p12 }
  0x1e   :  { %p236_p1 = pnand %p235_p0, %p229_p11 }
  0x20   :  { %239 = shalt.err (!%p236_p1)
}
  0x21   :  { %s270_s0 = smov 128   ;;  %s271_s7 = smov 8  }
  0x22   :  { %32 = dma.hbm_to_vmem [thread:$0]  %s347_s1, 512, %s296_s15, [#allocation6], %s270_s0, %s270_s0, %s271_s7  }
  0x23   :  { %262 = dma.done.wait [#allocation3], 128  }
  0x24   :  { %263 = vsyncadd [#allocation3], 4294967168 }
  0x25   :  { %264 = dma.done.wait [#allocation6], 512  }
  0x26   :  { %265 = vsyncadd [#allocation6], 4294966784  ;;  %v272_v0 = vmov 0.0|0.0   ;;  %vm273_vm0 = vmmov 0   ;;  %v274_v1 = vmov 0.0   ;;  %vm46_vm1 = vcmask 261120  }
  0x27   :  { %180 = vmatprep.subr.bf16.mxu0 %v272_v0  ;;  %177 = vmatprep.mubr.msk.f32.mxu0 %vm273_vm0, %v274_v1  ;;  %v42_v2 = vld [vmem:[#allocation5] sm:$0xff]  ;;  %v43_v3 = vld [vmem:[#allocation5 + $0x8] sm:$0xff]  ;;  %vm182_vm2 = vmpackc.low %vm46_vm1, %vm46_vm1  ;;  %s275_s11 = smov [#allocation7]  }
  0x28   :  { %v181_v4 = vpack.c.bf16 %v43_v3, %v42_v2  ;;  %v44_v5 = vld [vmem:[#allocation5 + $0x10] sm:$0xff]  ;;  %v45_v6 = vld [vmem:[#allocation5 + $0x18] sm:$0xff]  ;;  %s148_s12 = sshll.u32 %s275_s11, 4  ;;  %s149_s12 = int_to_ptr.vmem [resolvable:$true] %s148_s12 }
  0x29   :  { %v185_v7 = vpack.c.bf16 %v45_v6, %v44_v5  ;;  %v41_v8 = vld [vmem:[#allocation2] sm:$0xff]  ;;  %s240_s13 = scalar_lea.vmem %s149_s12, 128  ;;  %p245_p3 = scmp.lt.s32.totalorder %s149_s12, %s149_s12 }
  0x2a   :  { %183 = vmatpush3.bf16.xpose.msk.msra.mxu0 %vm182_vm2, %v181_v4  ;;  %v163_v10 = vld [vmem:[%s348_s2] ss:$0 sm:$0xff]  ;;  %p241_p2 = scmp.ne.s32.totalorder %s149_s12, %s240_s13  ;;  %p246_p4 = scmp.lt.s32.totalorder %s240_s13, %s240_s13 }
  0x2b   :  { %184 = vmatprep.subr.bf16.mxu0 %v272_v0 }
  0x2c   :  { %p247_p5 = por %p246_p4, %p245_p3 }
  0x2e   :  { %p248_p6 = pnand %p247_p5, %p241_p2 }
  0x32   :  { %187 = vmatpush3.bf16.xpose.msk.msra.mxu0 %vm182_vm2, %v185_v7 }
  0x39   :  { %178 = vmatmul.mubr.msk.f32.vlgmr.msra.gmra.mrb[0].mxu0 %vm46_vm1, %v41_v8 }
 0x10c   :  { %v128_v9 = vpop.f32.mrb[0].mxu0 }
 0x10d   :  { %v132_v11 = vmul.f32 0.088388346, %v128_v9  ;;  %v179_v12 = vpop.f32.mrb[1].mxu0 }
 0x10f   :  { %v140_v13 = vadd.f32 %v163_v10, %v132_v11 }
 0x111   :  { %141 = vst.msk [vmem:[#allocation7] sm:$0xff] %vm46_vm1, %v140_v13 }
 0x112   :  { %251 = shalt.err (!%p248_p6)
}
 0x113   :  { %s252_s16 = scalar_lea.hbm %s349_s3, 128 }
 0x114   :  { %p253_p7 = scmp.ne.s32.totalorder %s349_s3, %s252_s16  ;;  %p256_p8 = scmp.lt.u32.totalorder %s252_s16, %s349_s3 }
 0x116   :  { %p258_p9 = pnand %p256_p8, %p253_p7 }
 0x118   :  { %261 = shalt.err (!%p258_p9)
}
 0x119   :  { %151 = dma.vmem_to_hbm [thread:$0]  %s149_s12, 128, %s349_s3, [#allocation4]  }
 0x11a   :  { %266 = dma.done.wait [#allocation4], 128  }
 0x11b   :  { %267 = vsyncadd [#allocation4], 4294967168 }
 0x11c   :  { %155 = vsyncpa [#allocation3], 1 }
 0x11d   :  { %156 = vsyncpa [#allocation6], 1 }
 0x11e   :  { %157 = vsyncpa [#allocation4], 1 }

</bundles_post_ra>
